<compile_context>
chip_gen: v5e
topology: v5e:2x2
jax: 0.10.0
libtpu: 0.0.40
codegen_flags: <defaults>
</compile_context>

<pallas_src>
import functools

import jax
import jax.numpy as jnp
from jax.experimental import pallas as pl
from jax.experimental.pallas import tpu as pltpu


def _mha_kernel(q_ref, k_ref, v_ref, wq_ref, wkv_ref, wfc_ref, gamma_ref, beta_ref,
                o_ref, *attn_out,
                bt, lq, lk, d_model, n_head, d_k, d_v,
                inv_temperature, eps, compute_dtype, attn_dtype):
    """Fused MHA for a block of `bt` batch elements:
    Q/K/V projections -> per-head scaled-dot-product attention (batched over bt)
    -> output projection (accumulated per head) -> residual add -> LayerNorm."""
    f32 = jnp.float32
    cd = compute_dtype

    q2 = q_ref[...].reshape(bt * lq, d_model)                  # f32: residual / LN
    k2 = k_ref[...].reshape(bt * lk, d_model).astype(cd)
    v2 = v_ref[...].reshape(bt * lk, d_model).astype(cd)

    # --- Linear projections: one MXU matmul per tensor over all bt*L rows.
    # 1/temperature folded into Q (cheaper than scaling the (H, lq, lk) scores).
    qp = (jnp.dot(q2.astype(cd), wq_ref[...], preferred_element_type=f32)
          * inv_temperature).astype(cd)                        # (bt*lq, H*dk)
    kp = jnp.dot(k2, wkv_ref[...], preferred_element_type=f32).astype(cd)
    vp = jnp.dot(v2, wkv_ref[...], preferred_element_type=f32).astype(cd)

    qp3 = qp.reshape(bt, lq, n_head * d_k)
    kp3 = kp.reshape(bt, lk, n_head * d_k)
    vp3 = vp.reshape(bt, lk, n_head * d_v)

    # Output-projection accumulator, seeded with the residual (f32):
    #   y = residual + sum_h (attn_h @ V_h) @ W_fc[h*dv:(h+1)*dv, :]
    y = q2                                                     # (bt*lq, D)

    for h in range(n_head):                                    # static, H is small
        qs = qp3[:, :, h * d_k:(h + 1) * d_k]                  # (bt, lq, dk)
        ks = kp3[:, :, h * d_k:(h + 1) * d_k]                  # (bt, lk, dk)
        s = jnp.einsum('bqd,bkd->bqk', qs, ks,
                       preferred_element_type=f32)             # (bt, lq, lk)

        # Softmax in f32.  Divide replaced by EUP approx reciprocal; one Newton
        # step (2 cheap VPU ops on a (bt, lq, 1) column) restores ~f32 accuracy.
        m = jnp.max(s, axis=-1, keepdims=True)
        e = jnp.exp(s - m)
        denom = jnp.sum(e, axis=-1, keepdims=True)
        r = pl.reciprocal(denom, approx=True)
        r = r * (2.0 - denom * r)
        p = e * r                                              # (bt, lq, lk)

        if attn_out:                                           # direct store, no stack
            attn_out[0][:, h * lq:(h + 1) * lq, :] = p.astype(attn_dtype)

        vs = vp3[:, :, h * d_v:(h + 1) * d_v]                  # (bt, lk, dv)
        oh = jnp.einsum('bqk,bkd->bqd', p.astype(cd), vs,
                        preferred_element_type=f32)            # (bt, lq, dv)
        y = y + jnp.dot(oh.reshape(bt * lq, d_v).astype(cd),
                        wfc_ref[h * d_v:(h + 1) * d_v, :],
                        preferred_element_type=f32)            # (bt*lq, D)

    # --- LayerNorm over last dim (biased variance, eps inside sqrt), in f32.
    mu = jnp.mean(y, axis=-1, keepdims=True)
    yc = y - mu
    var = jnp.mean(yc * yc, axis=-1, keepdims=True)
    y_out = yc * jax.lax.rsqrt(var + eps) * gamma_ref[...] + beta_ref[...]

    o_ref[...] = y_out.reshape(bt, lq, d_model)


def _vmem_bytes(Lq, Lk, D, n_head, d_k, d_v, compute_dtype, attn_dtype, return_attn):
    """Rough per-batch-element VMEM bytes (double-buffered blocks + intermediates)."""
    cd_b = jnp.dtype(compute_dtype).itemsize
    at_b = jnp.dtype(attn_dtype).itemsize
    per_b = 2 * (2 * Lq * D * 4                      # q (f32) + o (f32) blocks
                 + 2 * Lk * D * cd_b                 # k, v blocks
                 + (n_head * Lq * Lk * at_b if return_attn else 0))
    per_b += ((Lq + 2 * Lk) * n_head * d_k * (4 + cd_b)   # projections (f32 + cd)
              + 3 * Lq * Lk * 4                           # score/softmax tiles
              + 2 * Lq * D * 4)                           # y accumulator etc.
    weights = 2 * cd_b * (2 * D * n_head * d_k + n_head * d_v * D) + 4 * 4 * D
    return per_b, weights


def _pick_batch_tile(B, per_b_bytes, budget_bytes):
    """Largest divisor of B that fits the budget and leaves >= 8/4/2 grid steps."""
    divisors = [d for d in range(1, B + 1) if B % d == 0]
    fits = [d for d in divisors if d * per_b_bytes <= budget_bytes] or [1]
    for min_steps in (8, 4, 2, 1):
        cand = [d for d in fits if B // d >= min_steps]
        if cand:
            return max(cand)
    return 1


def multi_head_attention(q, k, v, flag, params, *, n_head, d_k, d_v,
                         mask=None, return_attn=True,
                         compute_dtype=jnp.bfloat16, attn_dtype=jnp.float32,
                         batch_tile=None):
    """Pallas implementation of MultiHeadAttention.forward (eval mode, mask=None).

    compute_dtype: dtype of MXU matmul operands (default bf16; softmax / residual /
      LayerNorm always run in f32).  When bf16, k/v are kept bf16 in HBM.
    attn_dtype: dtype of the returned attention weights (bf16 halves the writeback).
    batch_tile: batch elements per grid step; default auto-picks from a VMEM budget
      while keeping >= 2 (ideally 4-8) pipelined grid steps.
    """
    # TODO(synk): attention mask path (mask != None) not implemented.
    assert mask is None, "mask path not implemented"

    B, Lq, D = q.shape
    Lk = k.shape[1]
    assert k.shape == (B, Lk, D) and v.shape == (B, Lk, D)
    # Both flag branches of the torch module view a (n_head*d_k / n_head*d_v)
    # projection with the other head dim, so d_k == d_v is required.
    assert d_k == d_v, "module semantics require d_k == d_v"

    if flag:
        wq, wkv = params['w_img'], params['w_cls']     # k and v share the same Linear
    else:
        wq, wkv = params['w_token'], params['w_img']
    wfc = params['w_fc']

    per_b, weight_bytes = _vmem_bytes(Lq, Lk, D, n_head, d_k, d_v,
                                      compute_dtype, attn_dtype, return_attn)
    if batch_tile is None:
        bt = _pick_batch_tile(B, per_b, budget_bytes=40 * 1024 * 1024)
    else:
        bt = int(batch_tile)
        assert B % bt == 0
    grid = (B // bt,)
    vmem_limit = int(min(56 * 1024 * 1024,
                         max(32 * 1024 * 1024,
                             bt * per_b + weight_bytes + (4 << 20))))

    f32 = jnp.float32
    q_in = q.astype(f32)                    # residual / LayerNorm path needs f32 q
    k_in = k.astype(compute_dtype)          # bf16 in HBM when compute is bf16
    v_in = v.astype(compute_dtype)
    wq_c = wq.astype(compute_dtype)
    wkv_c = wkv.astype(compute_dtype)
    wfc_c = wfc.astype(compute_dtype)
    gamma = params['gamma'].reshape(1, D).astype(f32)
    beta = params['beta'].reshape(1, D).astype(f32)

    kernel = functools.partial(
        _mha_kernel, bt=bt, lq=Lq, lk=Lk, d_model=D,
        n_head=n_head, d_k=d_k, d_v=d_v,
        inv_temperature=1.0 / (float(d_k) ** 0.5), eps=1e-6,
        compute_dtype=compute_dtype, attn_dtype=attn_dtype)

    in_specs = [
        pl.BlockSpec((bt, Lq, D), lambda i: (i, 0, 0)),          # q
        pl.BlockSpec((bt, Lk, D), lambda i: (i, 0, 0)),          # k
        pl.BlockSpec((bt, Lk, D), lambda i: (i, 0, 0)),          # v
        pl.BlockSpec((D, n_head * d_k), lambda i: (0, 0)),       # wq
        pl.BlockSpec((D, n_head * d_k), lambda i: (0, 0)),       # wkv (shared K/V)
        pl.BlockSpec((n_head * d_v, D), lambda i: (0, 0)),       # wfc
        pl.BlockSpec((1, D), lambda i: (0, 0)),                  # gamma
        pl.BlockSpec((1, D), lambda i: (0, 0)),                  # beta
    ]

    o_shape = jax.ShapeDtypeStruct((B, Lq, D), f32)
    o_spec = pl.BlockSpec((bt, Lq, D), lambda i: (i, 0, 0))
    if return_attn:
        out_shape = (o_shape,
                     jax.ShapeDtypeStruct((B, n_head * Lq, Lk), attn_dtype))
        out_specs = [o_spec,
                     pl.BlockSpec((bt, n_head * Lq, Lk), lambda i: (i, 0, 0))]
    else:
        out_shape = o_shape
        out_specs = o_spec

    grid_spec = pltpu.PrefetchScalarGridSpec(
        num_scalar_prefetch=0, grid=grid,
        in_specs=in_specs, out_specs=out_specs)

    result = pl.pallas_call(
        kernel,
        out_shape=out_shape,
        grid_spec=grid_spec,
        compiler_params=pltpu.CompilerParams(
            dimension_semantics=("parallel",),
            vmem_limit_bytes=vmem_limit),
    )(q_in, k_in, v_in, wq_c, wkv_c, wfc_c, gamma, beta)

    if return_attn:
        o, attn_flat = result
        return o, attn_flat.reshape(B, n_head, Lq, Lk)   # free HBM reshape
    return result


def _reference(q, k, v, flag, params, *, n_head, d_k, d_v):
    """Pure-JAX (f32) reference of the torch forward (dropout=identity, mask=None)."""
    B, Lq, D = q.shape
    Lk = k.shape[1]
    if flag:
        wq, wk, wv = params['w_img'], params['w_cls'], params['w_cls']
    else:
        wq, wk, wv = params['w_token'], params['w_img'], params['w_img']
    residual = q
    qh = (q @ wq).reshape(B, Lq, n_head, d_k).transpose(0, 2, 1, 3)
    kh = (k @ wk).reshape(B, Lk, n_head, d_k).transpose(0, 2, 1, 3)
    vh = (v @ wv).reshape(B, Lk, n_head, d_v).transpose(0, 2, 1, 3)
    attn = jax.nn.softmax(
        jnp.einsum('bhqd,bhkd->bhqk', qh / (d_k ** 0.5), kh), axis=-1)
    out = jnp.einsum('bhqk,bhkd->bhqd', attn, vh)
    out = out.transpose(0, 2, 1, 3).reshape(B, Lq, n_head * d_v)
    y = out @ params['w_fc'] + residual
    mu = jnp.mean(y, axis=-1, keepdims=True)
    var = jnp.mean((y - mu) ** 2, axis=-1, keepdims=True)
    y = (y - mu) / jnp.sqrt(var + 1e-6) * params['gamma'] + params['beta']
    return y, attn


if __name__ == "__main__":
    # Small shapes consistent with the module.
    B, L, D = 2, 8, 32
    n_head, d_k, d_v = 4, 8, 8   # module semantics require d_k == d_v

    key = jax.random.PRNGKey(0)
    k_q, k_k, k_v, k_w1, k_w2, k_w3, k_w4 = jax.random.split(key, 7)

    q = jax.random.normal(k_q, (B, L, D), dtype=jnp.float32)
    k = jax.random.normal(k_k, (B, L, D), dtype=jnp.float32)
    v = jax.random.normal(k_v, (B, L, D), dtype=jnp.float32)

    # Weights stored as (in, out) so y = x @ W (matches nn.Linear(W.T)).
    scale = 1.0 / (D ** 0.5)
    params = {
        'w_cls':   jax.random.normal(k_w1, (D, n_head * d_k), jnp.float32) * scale,
        'w_token': jax.random.normal(k_w2, (D, n_head * d_k), jnp.float32) * scale,
        'w_img':   jax.random.normal(k_w3, (D, n_head * d_v), jnp.float32) * scale,
        'w_fc':    jax.random.normal(k_w4, (n_head * d_v, D), jnp.float32) * scale,
        'gamma':   jnp.ones((D,), jnp.float32),
        'beta':    jnp.zeros((D,), jnp.float32),
    }

    # (out_tol, attn_tol) per compute dtype. bf16 path is looser (operand rounding).
    tol = {jnp.float32: (2e-3, 1e-3), jnp.bfloat16: (5e-2, 3e-2)}

    for flag in (True, False):
        ref_out, ref_attn = _reference(q, k, v, flag, params,
                                       n_head=n_head, d_k=d_k, d_v=d_v)
        for cd in (jnp.float32, jnp.bfloat16):
            out, attn = multi_head_attention(q, k, v, flag, params,
                                             n_head=n_head, d_k=d_k, d_v=d_v,
                                             compute_dtype=cd)
            out = jax.block_until_ready(out)
            attn = jax.block_until_ready(attn)
            out_tol, attn_tol = tol[cd]
            assert out.shape == (B, L, D) and attn.shape == (B, n_head, L, L)
            assert jnp.allclose(out, ref_out, atol=out_tol, rtol=out_tol), (flag, cd)
            assert jnp.allclose(attn, ref_attn, atol=attn_tol, rtol=attn_tol), (flag, cd)

    ref_out, ref_attn = _reference(q, k, v, True, params,
                                   n_head=n_head, d_k=d_k, d_v=d_v)

    # bf16 attention-weights writeback (halves attn VMEM/HBM bytes).
    out_bf, attn_bf = multi_head_attention(q, k, v, True, params,
                                           n_head=n_head, d_k=d_k, d_v=d_v,
                                           compute_dtype=jnp.float32,
                                           attn_dtype=jnp.bfloat16)
    out_bf = jax.block_until_ready(out_bf)
    attn_bf = jax.block_until_ready(attn_bf)
    assert jnp.allclose(out_bf, ref_out, atol=2e-3, rtol=2e-3)
    assert jnp.allclose(attn_bf.astype(jnp.float32), ref_attn, atol=2e-2, rtol=2e-2)

    # attn-writeback-free path (skips the O(L^2) HBM store).
    out_only = multi_head_attention(q, k, v, True, params,
                                    n_head=n_head, d_k=d_k, d_v=d_v,
                                    compute_dtype=jnp.float32, return_attn=False)
    out_only = jax.block_until_ready(out_only)
    assert jnp.allclose(out_only, ref_out, atol=2e-3, rtol=2e-3)

    # Explicit batch_tile (whole batch, grid=(1,)) still works.
    ref_out_f, _ = _reference(q, k, v, False, params,
                              n_head=n_head, d_k=d_k, d_v=d_v)
    out_bt, _ = multi_head_attention(q, k, v, False, params,
                                     n_head=n_head, d_k=d_k, d_v=d_v,
                                     compute_dtype=jnp.float32, batch_tile=B)
    out_bt = jax.block_until_ready(out_bt)
    assert jnp.allclose(out_bt, ref_out_f, atol=2e-3, rtol=2e-3)

    print("KERNEL_OK")
</pallas_src>

<mosaic_0001>
module attributes {stable_mosaic.version = 11 : i64} {
  func.func @_mha_kernel(%arg0: i32, %arg1: memref<1x8x32xf32, #tpu.memory_space<vmem>>, %arg2: memref<1x8x32xf32, #tpu.memory_space<vmem>>, %arg3: memref<1x8x32xf32, #tpu.memory_space<vmem>>, %arg4: memref<32x32xf32, #tpu.memory_space<vmem>>, %arg5: memref<32x32xf32, #tpu.memory_space<vmem>>, %arg6: memref<32x32xf32, #tpu.memory_space<vmem>>, %arg7: memref<1x32xf32, #tpu.memory_space<vmem>>, %arg8: memref<1x32xf32, #tpu.memory_space<vmem>>, %arg9: memref<1x8x32xf32, #tpu.memory_space<vmem>>, %arg10: memref<1x32x8xf32, #tpu.memory_space<vmem>>) attributes {dimension_semantics = [#tpu.dimension_semantics<parallel>], iteration_bounds = array<i64: 2>, scalar_prefetch = 0 : i64, scratch_operands = 0 : i64, tpu.core_type = #tpu.core_type<tc>, window_params = [{transform_indices = @transform_0, window_bounds = array<i64: 1, 8, 32>}, {transform_indices = @transform_1, window_bounds = array<i64: 1, 8, 32>}, {transform_indices = @transform_2, window_bounds = array<i64: 1, 8, 32>}, {pipeline_mode = #tpu.pipeline_mode<synchronous>, transform_indices = @transform_3, window_bounds = array<i64: 32, 32>}, {pipeline_mode = #tpu.pipeline_mode<synchronous>, transform_indices = @transform_4, window_bounds = array<i64: 32, 32>}, {pipeline_mode = #tpu.pipeline_mode<synchronous>, transform_indices = @transform_5, window_bounds = array<i64: 32, 32>}, {pipeline_mode = #tpu.pipeline_mode<synchronous>, transform_indices = @transform_6, window_bounds = array<i64: 1, 32>}, {pipeline_mode = #tpu.pipeline_mode<synchronous>, transform_indices = @transform_7, window_bounds = array<i64: 1, 32>}, {transform_indices = @transform_8, window_bounds = array<i64: 1, 8, 32>}, {transform_indices = @transform_9, window_bounds = array<i64: 1, 32, 8>}]} {
    %c0 = arith.constant 0 : index
    %c0_0 = arith.constant 0 : index
    %c0_1 = arith.constant 0 : index
    %0 = vector.load %arg1[%c0, %c0_0, %c0_1] : memref<1x8x32xf32, #tpu.memory_space<vmem>>, vector<1x8x32xf32>
    %1 = vector.shape_cast %0 : vector<1x8x32xf32> to vector<8x32xf32>
    %c0_2 = arith.constant 0 : index
    %c0_3 = arith.constant 0 : index
    %c0_4 = arith.constant 0 : index
    %2 = vector.load %arg2[%c0_2, %c0_3, %c0_4] : memref<1x8x32xf32, #tpu.memory_space<vmem>>, vector<1x8x32xf32>
    %3 = vector.shape_cast %2 : vector<1x8x32xf32> to vector<8x32xf32>
    %c0_5 = arith.constant 0 : index
    %c0_6 = arith.constant 0 : index
    %c0_7 = arith.constant 0 : index
    %4 = vector.load %arg3[%c0_5, %c0_6, %c0_7] : memref<1x8x32xf32, #tpu.memory_space<vmem>>, vector<1x8x32xf32>
    %5 = vector.shape_cast %4 : vector<1x8x32xf32> to vector<8x32xf32>
    %c0_8 = arith.constant 0 : index
    %c0_9 = arith.constant 0 : index
    %6 = vector.load %arg4[%c0_8, %c0_9] : memref<32x32xf32, #tpu.memory_space<vmem>>, vector<32x32xf32>
    %cst = arith.constant dense<0.000000e+00> : vector<8x32xf32>
    %7 = tpu.matmul %1, %6, %cst {dimension_numbers = #tpu.dot_dimension_numbers<[1], [0], [0], [1], [0, 0, 1, 1], [], []>} : vector<8x32xf32>, vector<32x32xf32>, vector<8x32xf32> -> vector<8x32xf32>
    %cst_10 = arith.constant 0.353553385 : f32
    %8 = vector.broadcast %cst_10 : f32 to vector<8x32xf32>
    %9 = arith.mulf %7, %8 : vector<8x32xf32>
    %c0_11 = arith.constant 0 : index
    %c0_12 = arith.constant 0 : index
    %10 = vector.load %arg5[%c0_11, %c0_12] : memref<32x32xf32, #tpu.memory_space<vmem>>, vector<32x32xf32>
    %cst_13 = arith.constant dense<0.000000e+00> : vector<8x32xf32>
    %11 = tpu.matmul %3, %10, %cst_13 {dimension_numbers = #tpu.dot_dimension_numbers<[1], [0], [0], [1], [0, 0, 1, 1], [], []>} : vector<8x32xf32>, vector<32x32xf32>, vector<8x32xf32> -> vector<8x32xf32>
    %c0_14 = arith.constant 0 : index
    %c0_15 = arith.constant 0 : index
    %12 = vector.load %arg5[%c0_14, %c0_15] : memref<32x32xf32, #tpu.memory_space<vmem>>, vector<32x32xf32>
    %cst_16 = arith.constant dense<0.000000e+00> : vector<8x32xf32>
    %13 = tpu.matmul %5, %12, %cst_16 {dimension_numbers = #tpu.dot_dimension_numbers<[1], [0], [0], [1], [0, 0, 1, 1], [], []>} : vector<8x32xf32>, vector<32x32xf32>, vector<8x32xf32> -> vector<8x32xf32>
    %14 = vector.shape_cast %9 : vector<8x32xf32> to vector<1x8x32xf32>
    %15 = vector.shape_cast %11 : vector<8x32xf32> to vector<1x8x32xf32>
    %16 = vector.shape_cast %13 : vector<8x32xf32> to vector<1x8x32xf32>
    %17 = vector.extract_strided_slice %14 {offsets = [0, 0, 0], sizes = [1, 8, 8], strides = [1, 1, 1]} : vector<1x8x32xf32> to vector<1x8x8xf32>
    %18 = vector.extract_strided_slice %15 {offsets = [0, 0, 0], sizes = [1, 8, 8], strides = [1, 1, 1]} : vector<1x8x32xf32> to vector<1x8x8xf32>
    "tpu.trace_start"() <{level = 10 : i32, message = "bqd,bkd->bqk"}> : () -> ()
    %cst_17 = arith.constant dense<0.000000e+00> : vector<1x8x8xf32>
    %19 = tpu.matmul %17, %18, %cst_17 {dimension_numbers = #tpu.dot_dimension_numbers<[2], [2], [1], [1], [0, 0, 0, 1, 1, 1], [0], [0]>} : vector<1x8x8xf32>, vector<1x8x8xf32>, vector<1x8x8xf32> -> vector<1x8x8xf32>
    "tpu.trace_stop"() : () -> ()
    %cst_18 = arith.constant dense<0xFF800000> : vector<1x8xf32>
    %20 = vector.multi_reduction <maximumf>, %19, %cst_18 [2] : vector<1x8x8xf32> to vector<1x8xf32>
    %21 = vector.shape_cast %20 : vector<1x8xf32> to vector<1x8x1xf32>
    %22 = vector.broadcast %21 : vector<1x8x1xf32> to vector<1x8x8xf32>
    %23 = arith.subf %19, %22 : vector<1x8x8xf32>
    %24 = math.exp %23 : vector<1x8x8xf32>
    %cst_19 = arith.constant dense<0.000000e+00> : vector<1x8xf32>
    %25 = vector.multi_reduction <add>, %24, %cst_19 [2] : vector<1x8x8xf32> to vector<1x8xf32>
    %26 = vector.shape_cast %25 : vector<1x8xf32> to vector<1x8x1xf32>
    %27 = tpu.reciprocal %26 {approx = true} : vector<1x8x1xf32> -> vector<1x8x1xf32>
    %28 = arith.mulf %26, %27 : vector<1x8x1xf32>
    %cst_20 = arith.constant 2.000000e+00 : f32
    %29 = vector.broadcast %cst_20 : f32 to vector<1x8x1xf32>
    %30 = arith.subf %29, %28 : vector<1x8x1xf32>
    %31 = arith.mulf %27, %30 : vector<1x8x1xf32>
    %32 = vector.broadcast %31 : vector<1x8x1xf32> to vector<1x8x8xf32>
    %33 = arith.mulf %24, %32 : vector<1x8x8xf32>
    %c0_21 = arith.constant 0 : index
    %c0_22 = arith.constant 0 : index
    %c0_23 = arith.constant 0 : index
    %34 = vector.load %arg10[%c0_21, %c0_22, %c0_23] : memref<1x32x8xf32, #tpu.memory_space<vmem>>, vector<1x8x8xf32>
    tpu.vector_store %arg10[%c0_21, %c0_22, %c0_23], %33 {strides = array<i32>} : memref<1x32x8xf32, #tpu.memory_space<vmem>>, vector<1x8x8xf32>,
    %35 = vector.extract_strided_slice %16 {offsets = [0, 0, 0], sizes = [1, 8, 8], strides = [1, 1, 1]} : vector<1x8x32xf32> to vector<1x8x8xf32>
    "tpu.trace_start"() <{level = 10 : i32, message = "bqk,bkd->bqd"}> : () -> ()
    %cst_24 = arith.constant dense<0.000000e+00> : vector<1x8x8xf32>
    %36 = tpu.matmul %33, %35, %cst_24 {dimension_numbers = #tpu.dot_dimension_numbers<[2], [1], [1], [2], [0, 0, 0, 1, 1, 2], [0], [0]>} : vector<1x8x8xf32>, vector<1x8x8xf32>, vector<1x8x8xf32> -> vector<1x8x8xf32>
    "tpu.trace_stop"() : () -> ()
    %37 = vector.shape_cast %36 : vector<1x8x8xf32> to vector<8x8xf32>
    %c0_25 = arith.constant 0 : index
    %c0_26 = arith.constant 0 : index
    %38 = vector.load %arg6[%c0_25, %c0_26] : memref<32x32xf32, #tpu.memory_space<vmem>>, vector<8x32xf32>
    %cst_27 = arith.constant dense<0.000000e+00> : vector<8x32xf32>
    %39 = tpu.matmul %37, %38, %cst_27 {dimension_numbers = #tpu.dot_dimension_numbers<[1], [0], [0], [1], [0, 0, 1, 1], [], []>} : vector<8x8xf32>, vector<8x32xf32>, vector<8x32xf32> -> vector<8x32xf32>
    %40 = arith.addf %1, %39 : vector<8x32xf32>
    %41 = vector.extract_strided_slice %14 {offsets = [0, 0, 8], sizes = [1, 8, 8], strides = [1, 1, 1]} : vector<1x8x32xf32> to vector<1x8x8xf32>
    %42 = vector.extract_strided_slice %15 {offsets = [0, 0, 8], sizes = [1, 8, 8], strides = [1, 1, 1]} : vector<1x8x32xf32> to vector<1x8x8xf32>
    "tpu.trace_start"() <{level = 10 : i32, message = "bqd,bkd->bqk"}> : () -> ()
    %cst_28 = arith.constant dense<0.000000e+00> : vector<1x8x8xf32>
    %43 = tpu.matmul %41, %42, %cst_28 {dimension_numbers = #tpu.dot_dimension_numbers<[2], [2], [1], [1], [0, 0, 0, 1, 1, 1], [0], [0]>} : vector<1x8x8xf32>, vector<1x8x8xf32>, vector<1x8x8xf32> -> vector<1x8x8xf32>
    "tpu.trace_stop"() : () -> ()
    %cst_29 = arith.constant dense<0xFF800000> : vector<1x8xf32>
    %44 = vector.multi_reduction <maximumf>, %43, %cst_29 [2] : vector<1x8x8xf32> to vector<1x8xf32>
    %45 = vector.shape_cast %44 : vector<1x8xf32> to vector<1x8x1xf32>
    %46 = vector.broadcast %45 : vector<1x8x1xf32> to vector<1x8x8xf32>
    %47 = arith.subf %43, %46 : vector<1x8x8xf32>
    %48 = math.exp %47 : vector<1x8x8xf32>
    %cst_30 = arith.constant dense<0.000000e+00> : vector<1x8xf32>
    %49 = vector.multi_reduction <add>, %48, %cst_30 [2] : vector<1x8x8xf32> to vector<1x8xf32>
    %50 = vector.shape_cast %49 : vector<1x8xf32> to vector<1x8x1xf32>
    %51 = tpu.reciprocal %50 {approx = true} : vector<1x8x1xf32> -> vector<1x8x1xf32>
    %52 = arith.mulf %50, %51 : vector<1x8x1xf32>
    %cst_31 = arith.constant 2.000000e+00 : f32
    %53 = vector.broadcast %cst_31 : f32 to vector<1x8x1xf32>
    %54 = arith.subf %53, %52 : vector<1x8x1xf32>
    %55 = arith.mulf %51, %54 : vector<1x8x1xf32>
    %56 = vector.broadcast %55 : vector<1x8x1xf32> to vector<1x8x8xf32>
    %57 = arith.mulf %48, %56 : vector<1x8x8xf32>
    %c0_32 = arith.constant 0 : index
    %c8 = arith.constant 8 : index
    %c0_33 = arith.constant 0 : index
    %58 = vector.load %arg10[%c0_32, %c8, %c0_33] : memref<1x32x8xf32, #tpu.memory_space<vmem>>, vector<1x8x8xf32>
    tpu.vector_store %arg10[%c0_32, %c8, %c0_33], %57 {strides = array<i32>} : memref<1x32x8xf32, #tpu.memory_space<vmem>>, vector<1x8x8xf32>,
    %59 = vector.extract_strided_slice %16 {offsets = [0, 0, 8], sizes = [1, 8, 8], strides = [1, 1, 1]} : vector<1x8x32xf32> to vector<1x8x8xf32>
    "tpu.trace_start"() <{level = 10 : i32, message = "bqk,bkd->bqd"}> : () -> ()
    %cst_34 = arith.constant dense<0.000000e+00> : vector<1x8x8xf32>
    %60 = tpu.matmul %57, %59, %cst_34 {dimension_numbers = #tpu.dot_dimension_numbers<[2], [1], [1], [2], [0, 0, 0, 1, 1, 2], [0], [0]>} : vector<1x8x8xf32>, vector<1x8x8xf32>, vector<1x8x8xf32> -> vector<1x8x8xf32>
    "tpu.trace_stop"() : () -> ()
    %61 = vector.shape_cast %60 : vector<1x8x8xf32> to vector<8x8xf32>
    %c8_35 = arith.constant 8 : index
    %c0_36 = arith.constant 0 : index
    %62 = vector.load %arg6[%c8_35, %c0_36] : memref<32x32xf32, #tpu.memory_space<vmem>>, vector<8x32xf32>
    %cst_37 = arith.constant dense<0.000000e+00> : vector<8x32xf32>
    %63 = tpu.matmul %61, %62, %cst_37 {dimension_numbers = #tpu.dot_dimension_numbers<[1], [0], [0], [1], [0, 0, 1, 1], [], []>} : vector<8x8xf32>, vector<8x32xf32>, vector<8x32xf32> -> vector<8x32xf32>
    %64 = arith.addf %40, %63 : vector<8x32xf32>
    %65 = vector.extract_strided_slice %14 {offsets = [0, 0, 16], sizes = [1, 8, 8], strides = [1, 1, 1]} : vector<1x8x32xf32> to vector<1x8x8xf32>
    %66 = vector.extract_strided_slice %15 {offsets = [0, 0, 16], sizes = [1, 8, 8], strides = [1, 1, 1]} : vector<1x8x32xf32> to vector<1x8x8xf32>
    "tpu.trace_start"() <{level = 10 : i32, message = "bqd,bkd->bqk"}> : () -> ()
    %cst_38 = arith.constant dense<0.000000e+00> : vector<1x8x8xf32>
    %67 = tpu.matmul %65, %66, %cst_38 {dimension_numbers = #tpu.dot_dimension_numbers<[2], [2], [1], [1], [0, 0, 0, 1, 1, 1], [0], [0]>} : vector<1x8x8xf32>, vector<1x8x8xf32>, vector<1x8x8xf32> -> vector<1x8x8xf32>
    "tpu.trace_stop"() : () -> ()
    %cst_39 = arith.constant dense<0xFF800000> : vector<1x8xf32>
    %68 = vector.multi_reduction <maximumf>, %67, %cst_39 [2] : vector<1x8x8xf32> to vector<1x8xf32>
    %69 = vector.shape_cast %68 : vector<1x8xf32> to vector<1x8x1xf32>
    %70 = vector.broadcast %69 : vector<1x8x1xf32> to vector<1x8x8xf32>
    %71 = arith.subf %67, %70 : vector<1x8x8xf32>
    %72 = math.exp %71 : vector<1x8x8xf32>
    %cst_40 = arith.constant dense<0.000000e+00> : vector<1x8xf32>
    %73 = vector.multi_reduction <add>, %72, %cst_40 [2] : vector<1x8x8xf32> to vector<1x8xf32>
    %74 = vector.shape_cast %73 : vector<1x8xf32> to vector<1x8x1xf32>
    %75 = tpu.reciprocal %74 {approx = true} : vector<1x8x1xf32> -> vector<1x8x1xf32>
    %76 = arith.mulf %74, %75 : vector<1x8x1xf32>
    %cst_41 = arith.constant 2.000000e+00 : f32
    %77 = vector.broadcast %cst_41 : f32 to vector<1x8x1xf32>
    %78 = arith.subf %77, %76 : vector<1x8x1xf32>
    %79 = arith.mulf %75, %78 : vector<1x8x1xf32>
    %80 = vector.broadcast %79 : vector<1x8x1xf32> to vector<1x8x8xf32>
    %81 = arith.mulf %72, %80 : vector<1x8x8xf32>
    %c0_42 = arith.constant 0 : index
    %c16 = arith.constant 16 : index
    %c0_43 = arith.constant 0 : index
    %82 = vector.load %arg10[%c0_42, %c16, %c0_43] : memref<1x32x8xf32, #tpu.memory_space<vmem>>, vector<1x8x8xf32>
    tpu.vector_store %arg10[%c0_42, %c16, %c0_43], %81 {strides = array<i32>} : memref<1x32x8xf32, #tpu.memory_space<vmem>>, vector<1x8x8xf32>,
    %83 = vector.extract_strided_slice %16 {offsets = [0, 0, 16], sizes = [1, 8, 8], strides = [1, 1, 1]} : vector<1x8x32xf32> to vector<1x8x8xf32>
    "tpu.trace_start"() <{level = 10 : i32, message = "bqk,bkd->bqd"}> : () -> ()
    %cst_44 = arith.constant dense<0.000000e+00> : vector<1x8x8xf32>
    %84 = tpu.matmul %81, %83, %cst_44 {dimension_numbers = #tpu.dot_dimension_numbers<[2], [1], [1], [2], [0, 0, 0, 1, 1, 2], [0], [0]>} : vector<1x8x8xf32>, vector<1x8x8xf32>, vector<1x8x8xf32> -> vector<1x8x8xf32>
    "tpu.trace_stop"() : () -> ()
    %85 = vector.shape_cast %84 : vector<1x8x8xf32> to vector<8x8xf32>
    %c16_45 = arith.constant 16 : index
    %c0_46 = arith.constant 0 : index
    %86 = vector.load %arg6[%c16_45, %c0_46] : memref<32x32xf32, #tpu.memory_space<vmem>>, vector<8x32xf32>
    %cst_47 = arith.constant dense<0.000000e+00> : vector<8x32xf32>
    %87 = tpu.matmul %85, %86, %cst_47 {dimension_numbers = #tpu.dot_dimension_numbers<[1], [0], [0], [1], [0, 0, 1, 1], [], []>} : vector<8x8xf32>, vector<8x32xf32>, vector<8x32xf32> -> vector<8x32xf32>
    %88 = arith.addf %64, %87 : vector<8x32xf32>
    %89 = vector.extract_strided_slice %14 {offsets = [0, 0, 24], sizes = [1, 8, 8], strides = [1, 1, 1]} : vector<1x8x32xf32> to vector<1x8x8xf32>
    %90 = vector.extract_strided_slice %15 {offsets = [0, 0, 24], sizes = [1, 8, 8], strides = [1, 1, 1]} : vector<1x8x32xf32> to vector<1x8x8xf32>
    "tpu.trace_start"() <{level = 10 : i32, message = "bqd,bkd->bqk"}> : () -> ()
    %cst_48 = arith.constant dense<0.000000e+00> : vector<1x8x8xf32>
    %91 = tpu.matmul %89, %90, %cst_48 {dimension_numbers = #tpu.dot_dimension_numbers<[2], [2], [1], [1], [0, 0, 0, 1, 1, 1], [0], [0]>} : vector<1x8x8xf32>, vector<1x8x8xf32>, vector<1x8x8xf32> -> vector<1x8x8xf32>
    "tpu.trace_stop"() : () -> ()
    %cst_49 = arith.constant dense<0xFF800000> : vector<1x8xf32>
    %92 = vector.multi_reduction <maximumf>, %91, %cst_49 [2] : vector<1x8x8xf32> to vector<1x8xf32>
    %93 = vector.shape_cast %92 : vector<1x8xf32> to vector<1x8x1xf32>
    %94 = vector.broadcast %93 : vector<1x8x1xf32> to vector<1x8x8xf32>
    %95 = arith.subf %91, %94 : vector<1x8x8xf32>
    %96 = math.exp %95 : vector<1x8x8xf32>
    %cst_50 = arith.constant dense<0.000000e+00> : vector<1x8xf32>
    %97 = vector.multi_reduction <add>, %96, %cst_50 [2] : vector<1x8x8xf32> to vector<1x8xf32>
    %98 = vector.shape_cast %97 : vector<1x8xf32> to vector<1x8x1xf32>
    %99 = tpu.reciprocal %98 {approx = true} : vector<1x8x1xf32> -> vector<1x8x1xf32>
    %100 = arith.mulf %98, %99 : vector<1x8x1xf32>
    %cst_51 = arith.constant 2.000000e+00 : f32
    %101 = vector.broadcast %cst_51 : f32 to vector<1x8x1xf32>
    %102 = arith.subf %101, %100 : vector<1x8x1xf32>
    %103 = arith.mulf %99, %102 : vector<1x8x1xf32>
    %104 = vector.broadcast %103 : vector<1x8x1xf32> to vector<1x8x8xf32>
    %105 = arith.mulf %96, %104 : vector<1x8x8xf32>
    %c0_52 = arith.constant 0 : index
    %c24 = arith.constant 24 : index
    %c0_53 = arith.constant 0 : index
    %106 = vector.load %arg10[%c0_52, %c24, %c0_53] : memref<1x32x8xf32, #tpu.memory_space<vmem>>, vector<1x8x8xf32>
    tpu.vector_store %arg10[%c0_52, %c24, %c0_53], %105 {strides = array<i32>} : memref<1x32x8xf32, #tpu.memory_space<vmem>>, vector<1x8x8xf32>,
    %107 = vector.extract_strided_slice %16 {offsets = [0, 0, 24], sizes = [1, 8, 8], strides = [1, 1, 1]} : vector<1x8x32xf32> to vector<1x8x8xf32>
    "tpu.trace_start"() <{level = 10 : i32, message = "bqk,bkd->bqd"}> : () -> ()
    %cst_54 = arith.constant dense<0.000000e+00> : vector<1x8x8xf32>
    %108 = tpu.matmul %105, %107, %cst_54 {dimension_numbers = #tpu.dot_dimension_numbers<[2], [1], [1], [2], [0, 0, 0, 1, 1, 2], [0], [0]>} : vector<1x8x8xf32>, vector<1x8x8xf32>, vector<1x8x8xf32> -> vector<1x8x8xf32>
    "tpu.trace_stop"() : () -> ()
    %109 = vector.shape_cast %108 : vector<1x8x8xf32> to vector<8x8xf32>
    %c24_55 = arith.constant 24 : index
    %c0_56 = arith.constant 0 : index
    %110 = vector.load %arg6[%c24_55, %c0_56] : memref<32x32xf32, #tpu.memory_space<vmem>>, vector<8x32xf32>
    %cst_57 = arith.constant dense<0.000000e+00> : vector<8x32xf32>
    %111 = tpu.matmul %109, %110, %cst_57 {dimension_numbers = #tpu.dot_dimension_numbers<[1], [0], [0], [1], [0, 0, 1, 1], [], []>} : vector<8x8xf32>, vector<8x32xf32>, vector<8x32xf32> -> vector<8x32xf32>
    %112 = arith.addf %88, %111 : vector<8x32xf32>
    %cst_58 = arith.constant dense<0.000000e+00> : vector<8xf32>
    %113 = vector.multi_reduction <add>, %112, %cst_58 [1] : vector<8x32xf32> to vector<8xf32>
    %114 = vector.shape_cast %113 : vector<8xf32> to vector<8x1xf32>
    %cst_59 = arith.constant 3.200000e+01 : f32
    %115 = vector.broadcast %cst_59 : f32 to vector<8x1xf32>
    %116 = arith.divf %114, %115 : vector<8x1xf32>
    %117 = vector.broadcast %116 : vector<8x1xf32> to vector<8x32xf32>
    %118 = arith.subf %112, %117 : vector<8x32xf32>
    %119 = arith.mulf %118, %118 : vector<8x32xf32>
    %cst_60 = arith.constant dense<0.000000e+00> : vector<8xf32>
    %120 = vector.multi_reduction <add>, %119, %cst_60 [1] : vector<8x32xf32> to vector<8xf32>
    %121 = vector.shape_cast %120 : vector<8xf32> to vector<8x1xf32>
    %cst_61 = arith.constant 3.200000e+01 : f32
    %122 = vector.broadcast %cst_61 : f32 to vector<8x1xf32>
    %123 = arith.divf %121, %122 : vector<8x1xf32>
    %cst_62 = arith.constant 9.99999997E-7 : f32
    %124 = vector.broadcast %cst_62 : f32 to vector<8x1xf32>
    %125 = arith.addf %123, %124 : vector<8x1xf32>
    %126 = math.rsqrt %125 : vector<8x1xf32>
    %127 = vector.broadcast %126 : vector<8x1xf32> to vector<8x32xf32>
    %128 = arith.mulf %118, %127 : vector<8x32xf32>
    %c0_63 = arith.constant 0 : index
    %c0_64 = arith.constant 0 : index
    %129 = vector.load %arg7[%c0_63, %c0_64] : memref<1x32xf32, #tpu.memory_space<vmem>>, vector<1x32xf32>
    %130 = vector.broadcast %129 : vector<1x32xf32> to vector<8x32xf32>
    %131 = arith.mulf %128, %130 : vector<8x32xf32>
    %c0_65 = arith.constant 0 : index
    %c0_66 = arith.constant 0 : index
    %132 = vector.load %arg8[%c0_65, %c0_66] : memref<1x32xf32, #tpu.memory_space<vmem>>, vector<1x32xf32>
    %133 = vector.broadcast %132 : vector<1x32xf32> to vector<8x32xf32>
    %134 = arith.addf %131, %133 : vector<8x32xf32>
    %135 = vector.shape_cast %134 : vector<8x32xf32> to vector<1x8x32xf32>
    %c0_67 = arith.constant 0 : index
    %c0_68 = arith.constant 0 : index
    %c0_69 = arith.constant 0 : index
    %136 = vector.load %arg9[%c0_67, %c0_68, %c0_69] : memref<1x8x32xf32, #tpu.memory_space<vmem>>, vector<1x8x32xf32>
    tpu.vector_store %arg9[%c0_67, %c0_68, %c0_69], %135 {strides = array<i32>} : memref<1x8x32xf32, #tpu.memory_space<vmem>>, vector<1x8x32xf32>,
    return
  }
  func.func @transform_0(%arg0: i32) -> (i32, i32, i32) {
    %c0_i32 = arith.constant 0 : i32
    %c0_i32_0 = arith.constant 0 : i32
    %c0_i32_1 = arith.constant 0 : i32
    return %arg0, %c0_i32, %c0_i32_0 : i32, i32, i32
  }
  func.func @transform_1(%arg0: i32) -> (i32, i32, i32) {
    %c0_i32 = arith.constant 0 : i32
    %c0_i32_0 = arith.constant 0 : i32
    %c0_i32_1 = arith.constant 0 : i32
    return %arg0, %c0_i32, %c0_i32_0 : i32, i32, i32
  }
  func.func @transform_2(%arg0: i32) -> (i32, i32, i32) {
    %c0_i32 = arith.constant 0 : i32
    %c0_i32_0 = arith.constant 0 : i32
    %c0_i32_1 = arith.constant 0 : i32
    return %arg0, %c0_i32, %c0_i32_0 : i32, i32, i32
  }
  func.func @transform_3(%arg0: i32) -> (i32, i32) {
    %c0_i32 = arith.constant 0 : i32
    %c0_i32_0 = arith.constant 0 : i32
    %c0_i32_1 = arith.constant 0 : i32
    return %c0_i32, %c0_i32_0 : i32, i32
  }
  func.func @transform_4(%arg0: i32) -> (i32, i32) {
    %c0_i32 = arith.constant 0 : i32
    %c0_i32_0 = arith.constant 0 : i32
    %c0_i32_1 = arith.constant 0 : i32
    return %c0_i32, %c0_i32_0 : i32, i32
  }
  func.func @transform_5(%arg0: i32) -> (i32, i32) {
    %c0_i32 = arith.constant 0 : i32
    %c0_i32_0 = arith.constant 0 : i32
    %c0_i32_1 = arith.constant 0 : i32
    return %c0_i32, %c0_i32_0 : i32, i32
  }
  func.func @transform_6(%arg0: i32) -> (i32, i32) {
    %c0_i32 = arith.constant 0 : i32
    %c0_i32_0 = arith.constant 0 : i32
    %c0_i32_1 = arith.constant 0 : i32
    return %c0_i32, %c0_i32_0 : i32, i32
  }
  func.func @transform_7(%arg0: i32) -> (i32, i32) {
    %c0_i32 = arith.constant 0 : i32
    %c0_i32_0 = arith.constant 0 : i32
    %c0_i32_1 = arith.constant 0 : i32
    return %c0_i32, %c0_i32_0 : i32, i32
  }
  func.func @transform_8(%arg0: i32) -> (i32, i32, i32) {
    %c0_i32 = arith.constant 0 : i32
    %c0_i32_0 = arith.constant 0 : i32
    %c0_i32_1 = arith.constant 0 : i32
    return %arg0, %c0_i32, %c0_i32_0 : i32, i32, i32
  }
  func.func @transform_9(%arg0: i32) -> (i32, i32, i32) {
    %c0_i32 = arith.constant 0 : i32
    %c0_i32_0 = arith.constant 0 : i32
    %c0_i32_1 = arith.constant 0 : i32
    return %arg0, %c0_i32, %c0_i32_0 : i32, i32, i32
  }
}

</mosaic_0001>

<bundles_post_ra>
// kernel: tpu_custom_call.1
= control target key start
LH: loop header
LB: loop body
LE: loop exit
PB: predicated region body
PF: predicated region fallthrough
CT: control target
= control target key end

     0   :  { %s1949_s0 = inlined_call_operand.hbm [shape: f32[2,8,32], index: 0, kind: input, shape index: {}]   ;;  %s1950_s1 = inlined_call_operand.hbm [shape: f32[2,8,32], index: 1, kind: input, shape index: {}]   ;;  %s1951_s2 = inlined_call_operand.hbm [shape: f32[2,8,32], index: 2, kind: input, shape index: {}]   ;;  %s1952_s3 = inlined_call_operand.hbm [shape: f32[32,32], index: 3, kind: input, shape index: {}]   ;;  %s1953_s4 = inlined_call_operand.hbm [shape: f32[32,32], index: 4, kind: input, shape index: {}]   ;;  %s1954_s5 = inlined_call_operand.hbm [shape: f32[32,32], index: 5, kind: input, shape index: {}]   ;;  %s1955_s6 = inlined_call_operand.vmem [shape: f32[1,32], index: 6, kind: input, shape index: {}]   ;;  %s1956_s7 = inlined_call_operand.vmem [shape: f32[1,32], index: 7, kind: input, shape index: {}]   ;;  %s1957_s8 = inlined_call_operand.hbm [shape: f32[2,8,32], index: 8, kind: output, shape index: {0}]   ;;  %s1958_s9 = inlined_call_operand.vmem [shape: f32[2,32,8], index: 9, kind: output, shape index: {1}]  }
   0x1   :  { %1972 = sst [smem:[#allocation25_spill]] %s1950_s1 }
   0x2   :  { %1973 = sst [smem:[#allocation26_spill]] %s1952_s3 }
   0x3   :  { %1974 = sst [smem:[#allocation27_spill]] %s1956_s7 }
   0x4   :  { %15 = vsyncpa [#allocation3], 0 }
   0x5   :  { %17 = vsyncpa [#allocation3 + $0x1], 0 }
   0x6   :  { %18 = vsyncpa [#allocation6], 0 }
   0x7   :  { %20 = vsyncpa [#allocation6 + $0x1], 0 }
   0x8   :  { %21 = vsyncpa [#allocation9], 0 }
   0x9   :  { %22 = vsyncpa [#allocation12], 0 }
   0xa   :  { %23 = vsyncpa [#allocation4], 0 }
   0xb   :  { %25 = vsyncpa [#allocation4 + $0x1], 0  ;;  %s1654_s30 = smov 0   ;;  %s1656_s10 = smov 0  }
   0xc   :  { %s1658_s11 = smov 0   ;;  %s1660_s12 = smov 0  }
   0xd LB: > { %1975 = sst [smem:[#allocation19_spill]] %s1581_s30  ;;  %s1678_s16 = sadd.s32 4294967295, %s1593_s12   ;;  %s1593_s12 = sphi %s1660_s12, %s2002_s12   ;;  %s1589_s11 = sphi %s1658_s11, %s2006_s11   ;;  %s1585_s10 = sphi %s1656_s10, %s2005_s10   ;;  %s1581_s30 = sphi %s1654_s30, %s2004_s30  }
   0xe   : > { %1976 = sst [smem:[#allocation20_spill]] %s1593_s12  ;;  %p1175_p0 = scmp.ge.s32.totalorder %s1593_s12, 1 }
   0xf   : > { %s1977_s3 = sld [smem:[#allocation26_spill]]  ;;  %p1971_p1 = scmp.eq.s32.totalorder %s1678_s16, 0 }
  0x10   : > { %p271_p2 = scmp.lt.s32.totalorder %s1593_s12, 3  ;;  %s1595_s18 = smov [#allocation8]  }
  0x11   : > { %s284_s19 = sshll.u32 %s1595_s18, 4  ;;  %s1959_s21 = smov 128   ;;  %s285_s19 = int_to_ptr.vmem [resolvable:$true] %s284_s19 }
  0x12   : > { %p1683_p3 = pnand %p1175_p0, %p271_p2  ;;  %s1961_s22 = smov 8  }
  0x13   : > { %s1174_s23 = sadd.s32 4294967294, %s1593_s12   ;;  %s1703_s24 = sadd.s32 1, %s1593_s12  }
  0x14   : > { %p1240_p4 = pneg %p1683_p3  ;;  %1980 = sst [smem:[#allocation21_spill]] %s1703_s24 }
  0x15   : > { %s282_s15 = sshll.u32 %s1977_s3, 4  ;;  %s38_s25 = sadd.s32 1, %s1589_s11  ;;  %s283_s15 = int_to_ptr.hbm [resolvable:$true] %s282_s15 }
  0x16   : > { %p1692_p6 = pnand %p1240_p4, %p1971_p1  ;;  %s35_s26 = ssub.s32 %s1593_s12, %s1703_s24 }
  0x17   : > { %p45_p7 = scmp.ne.s32.totalorder %s1589_s11, %s1585_s10  ;;  %p36_p8 = scmp.eq.s32.totalorder %s35_s26, 0 }
  0x18   : > { %1243 = dma.hbm_to_vmem [thread:$0]  (!%p1692_p6), %s283_s15, 512, %s285_s19, [#allocation9], %s1959_s21, %s1959_s21, %s1961_s22  }
  0x19   : > { %p46_p9 = scmp.eq.s32.totalorder %s1593_s12, 0  ;;  %p51_p10 = scmp.ne.s32.totalorder %s1585_s10, %s1581_s30 }
  0x1a   : > { %p232_p11 = scmp.eq.s32.totalorder %s1678_s16, 1  ;;  %p238_p2 = scmp.eq.s32.totalorder %s1174_s23, 1 }
  0x1b   : > { %s1715_s27 = scalar_select %p36_p8, %s1589_s11, %s38_s25  }
  0x1c   : > { %p47_p12 = por %p46_p9, %p45_p7  ;;  %p1719_p13 = por %p1971_p1, %p51_p10 }
  0x1d   : > { %1981 = sst [smem:[#allocation22_spill]] %s1715_s27  ;;  %p1723_p0 = por %p232_p11, %p45_p7 }
  0x1e   : > { %p1267_p4 = scmp.lt.s32.totalorder %s1593_s12, 2  ;;  %s1963_s13 = sand.u32 1, %s1589_s11  }
  0x1f   : > { %s1983_s29 = scalar_select %p1723_p0, 1, 0 }
  0x20   : > { %p1729_p5 = por %p238_p2, %p51_p10  ;;  %s1735_s15 = sshll.u32 %s1963_s13, 3 }
  0x21   : > { %1984 = sst [smem:[#allocation23_spill]] %s1983_s29  ;;  %s1738_s18 = sshll.u32 %s1593_s12, 3 }
  0x22   : > { %s1985_s14 = scalar_select %p1729_p5, 1, 0 }
  0x23   : > { %p1740_p8 = pnand %p1267_p4, %p47_p12  ;;  %s351_s23 = sand.u32 1, %s1593_s12  }
  0x24   : > { %1986 = sst [smem:[#allocation24_spill]] %s1985_s14  ;;  %s355_s22 = scalar_lea.vmem [#allocation5], %s1735_s15 }
  0x25   : > { %s1988_s1 = sld [smem:[#allocation25_spill]]  ;;  %s363_s3 = sshll.u32 %s355_s22, 4  ;;  %s364_s3 = int_to_ptr.vmem [resolvable:$true] %s363_s3 }
  0x26   : > { %s296_s14 = sshll.u32 %s1953_s4, 4  ;;  %s1753_s30 = scalar_lea.sflag [#allocation6], %s351_s23  ;;  %s297_s14 = int_to_ptr.hbm [resolvable:$true] %s296_s14 }
  0x27   : > { %p1369_p9 = pneg %p1740_p8 }
  0x2b   : > { %s359_s21 = scalar_lea.hbm %s1988_s1, %s1738_s18  ;;  %s1372_s25 = scalar_lea.hbm %s1988_s1, 16 }
  0x2c   : > { %s361_s27 = sshll.u32 %s359_s21, 4  ;;  %s362_s27 = int_to_ptr.hbm [resolvable:$true] %s361_s27 }
  0x2d   : > { %s1365_s7 = sshra.s32 %s362_s27, 4  ;;  %s1366_s7 = int_to_ptr.hbm [resolvable:$true] %s1365_s7 }
  0x2e   : > { %s1367_s29 = scalar_lea.hbm %s1366_s7, 8  ;;  %p1373_p12 = scmp.lt.s32.totalorder %s1366_s7, %s1988_s1 }
  0x2f   : > { %p1368_p7 = scmp.ne.s32.totalorder %s1366_s7, %s1367_s29  ;;  %p1374_p2 = scmp.lt.s32.totalorder %s1372_s25, %s1367_s29 }
  0x31   : > { %p1370_p10 = pnand %p1369_p9, %p1368_p7  ;;  %p1375_p4 = por %p1374_p2, %p1373_p12 }
  0x33   : > { %p1371_p11 = pneg %p1370_p10 }
  0x35   : > { %p1376_p1 = pnand %p1375_p4, %p1371_p11 }
  0x37   : > { %1379 = shalt.err (!%p1376_p1)
}
  0x38   : > { %1256 = dma.hbm_to_vmem [thread:$0]  (!%p1740_p8), %s362_s27, 128, %s364_s3, %s1753_s30  }
  0x39   : > { %s1598_s24 = smov [#allocation10]   ;;  %s310_s7 = sshll.u32 %s1954_s5, 4  ;;  %s311_s7 = int_to_ptr.hbm [resolvable:$true] %s310_s7 }
  0x3a   : > { %s298_s13 = sshll.u32 %s1598_s24, 4  ;;  %s1989_s12 = smov 8   ;;  %s299_s13 = int_to_ptr.vmem [resolvable:$true] %s298_s13 }
  0x3b   : > { %s1990_s29 = smov 128   ;;  %s1599_s21 = smov [#allocation11]  }
  0x3c   : > { %1246 = dma.hbm_to_vmem [thread:$0]  (!%p1692_p6), %s297_s14, 512, %s299_s13, [#allocation9], %s1990_s29, %s1990_s29, %s1989_s12  }
  0x3d   : > { %s312_s25 = sshll.u32 %s1599_s21, 4  ;;  %s340_s26 = scalar_lea.hbm %s1949_s0, %s1738_s18  ;;  %s313_s25 = int_to_ptr.vmem [resolvable:$true] %s312_s25 }
  0x3e   : > { %1249 = dma.hbm_to_vmem [thread:$0]  (!%p1692_p6), %s311_s7, 512, %s313_s25, [#allocation12], %s1990_s29, %s1990_s29, %s1989_s12  }
  0x3f   : > { %s342_s24 = sshll.u32 %s340_s26, 4  ;;  %s336_s23 = scalar_lea.vmem [#allocation2], %s1735_s15  ;;  %s343_s24 = int_to_ptr.hbm [resolvable:$true] %s342_s24 }
  0x40   : > { %s344_s22 = sshll.u32 %s336_s23, 4  ;;  %s1991_s1 = sand.u32 1, %s1589_s11   ;;  %s345_s22 = int_to_ptr.vmem [resolvable:$true] %s344_s22 }
  0x41   : > { %s333_s14 = scalar_lea.sflag [#allocation3], %s1991_s1  ;;  %s1455_s13 = sshra.s32 %s343_s24, 4  ;;  %s1456_s13 = int_to_ptr.hbm [resolvable:$true] %s1455_s13 }
  0x42   : > { %s1457_s21 = scalar_lea.hbm %s1456_s13, 8  ;;  %s1462_s27 = scalar_lea.hbm %s1949_s0, 16 }
  0x43   : > { %p1458_p1 = scmp.ne.s32.totalorder %s1456_s13, %s1457_s21  ;;  %p1463_p6 = scmp.lt.s32.totalorder %s1456_s13, %s1949_s0 }
  0x44   : > { %p1464_p11 = scmp.lt.s32.totalorder %s1462_s27, %s1457_s21 }
  0x45   : > { %p1460_p7 = pnand %p1458_p1, %p1369_p9 }
  0x46   : > { %p1465_p12 = por %p1464_p11, %p1463_p6 }
  0x47   : > { %p1461_p10 = pneg %p1460_p7 }
  0x49   : > { %p1466_p2 = pnand %p1465_p12, %p1461_p10 }
  0x4b   : > { %1469 = shalt.err (!%p1466_p2)
}
  0x4c   : > { %1253 = dma.hbm_to_vmem [thread:$0]  (!%p1740_p8), %s343_s24, 128, %s345_s22, %s333_s14  }
  0x4d   : > { %s378_s25 = scalar_lea.hbm %s1951_s2, %s1738_s18  ;;  %s374_s23 = scalar_lea.vmem [#allocation7], %s1735_s15 }
  0x4e   : > { %s380_s26 = sshll.u32 %s378_s25, 4  ;;  %s382_s20 = sshll.u32 %s374_s23, 4  ;;  %s381_s26 = int_to_ptr.hbm [resolvable:$true] %s380_s26  ;;  %s383_s20 = int_to_ptr.vmem [resolvable:$true] %s382_s20 }
  0x4f   : > { %s1485_s13 = sshra.s32 %s381_s26, 4  ;;  %s1492_s24 = scalar_lea.hbm %s1951_s2, 16  ;;  %s1486_s13 = int_to_ptr.hbm [resolvable:$true] %s1485_s13 }
  0x50   : > { %s1487_s21 = scalar_lea.hbm %s1486_s13, 8  ;;  %p1493_p10 = scmp.lt.s32.totalorder %s1486_s13, %s1951_s2 }
  0x51   : > { %p1488_p4 = scmp.ne.s32.totalorder %s1486_s13, %s1487_s21  ;;  %p1494_p6 = scmp.lt.s32.totalorder %s1492_s24, %s1487_s21 }
  0x53   : > { %p1490_p1 = pnand %p1488_p4, %p1369_p9  ;;  %p1495_p11 = por %p1494_p6, %p1493_p10 }
  0x55   : > { %p1491_p7 = pneg %p1490_p1 }
  0x57   : > { %p1496_p12 = pnand %p1495_p11, %p1491_p7 }
  0x59   : > { %1499 = shalt.err (!%p1496_p12)
}
  0x5a   : > { %1259 = dma.hbm_to_vmem [thread:$0]  (!%p1740_p8), %s381_s26, 128, %s383_s20, %s1753_s30  }
  0x5b   : > { %391 = sbr.rel (%p1683_p3) target bundleno = 1806 (0x70e), region = 52  ;;  %s1820_s15 = sand.u32 (!%p1683_p3), 1, %s1585_s10  }
  0x5c   : > { %s1823_s18 = sshll.u32 (!%p1683_p3), %s1820_s15, 3  ;;  %s394_s7 = scalar_lea.sflag (!%p1683_p3), [#allocation3], %s1820_s15 }
  0x5d   : > { %s397_s12 = scalar_lea.vmem (!%p1683_p3), [#allocation2], %s1823_s18 }
  0x60   : > { %1560 = dma.done.wait (%p1719_p13), %s394_s7, 128  }
  0x61   : > { %1562 = vsyncadd (%p1719_p13), %s394_s7, 4294967168  ;;  %s403_s30 = sand.u32 1, %s1678_s16   ;;  %s407_s19 = scalar_lea.vmem [#allocation5], %s1823_s18 }
  0x62   : > { %s404_s17 = scalar_lea.sflag [#allocation6], %s403_s30 }
  0x63   : > { %1564 = dma.done.wait (%p1719_p13), %s404_s17, 256  }
  0x64   : > { %1566 = vsyncadd (%p1719_p13), %s404_s17, 4294967040  ;;  %s417_s1 = scalar_lea.vmem [#allocation7], %s1823_s18  ;;  %p1992_p3 = scmp.eq.s32.totalorder %s1678_s16, 0 }
  0x66   : > { %1568 = dma.done.wait (%p1992_p3), [#allocation9], 1024   ;;  %p1993_p8 = pmov %p1992_p3 }
  0x67   : > { %p1994_p9 = pmov %p1992_p3 }
  0x68   : > { %1570 = vsyncadd (%p1993_p8), [#allocation9], 4294966272 }
  0x69   : > { %1572 = dma.done.wait (%p1994_p9), [#allocation12], 512   ;;  %p1995_p2 = pmov %p1992_p3 }
  0x6a   : > { %v523_v0 = vld [vmem:[#allocation10 + $0x18] sm:$0xff]  ;;  %v522_v2 = vld [vmem:[#allocation10 + $0x10] sm:$0xff]  ;;  %v521_v4 = vld [vmem:[#allocation10 + $0x8] sm:$0xff]  ;;  %vm495_vm0 = vcmask 261120   ;;  %vm570_vm1 = vcmask 64512   ;;  %s1600_s28 = smov 120  }
  0x6b   : > { %1574 = vsyncadd (%p1995_p2), [#allocation12], 4294966784  ;;  %v494_v1 = vld [vmem:[#allocation8 + $0x18] sm:$0xff]  ;;  %539 = vmatpush.msra.mxu1 %v523_v0  ;;  %v493_v3 = vld [vmem:[#allocation8 + $0x10] sm:$0xff]  ;;  %562 = vmatpush.msra.mxu2 %v523_v0  ;;  %s1601_s29 = smov 112   ;;  %s1602_s25 = smov 104  }
  0x6c   : > { %511 = vmatpush.msra.mxu0 %v494_v1  ;;  %v492_v5 = vld [vmem:[#allocation8 + $0x8] sm:$0xff]  ;;  %v520_v6 = vld [vmem:[#allocation10] sm:$0xff]  ;;  %v1848_v9 = vld [vmem:[%s397_s12] sm:$0xff]  ;;  %p483_p13 = scmp.lt.s32.totalorder %s1678_s16, 1  ;;  %s1216_s3 = sshll.u32 %s1678_s16, 3 }
  0x6d   : > { %540 = vmatpush.msra.mxu1 %v522_v2  ;;  %v491_v7 = vld [vmem:[#allocation8] sm:$0xff]  ;;  %563 = vmatpush.msra.mxu2 %v522_v2  ;;  %v490_v10 = vld [vmem:[%s417_s1] sm:$0xff]  ;;  %v730_v40 = vld [vmem:[#allocation11 + $0x8] sm:$0xff]  ;;  %s999_s7 = scalar_lea.hbm %s1957_s8, %s1216_s3 }
  0x6e   : > { %512 = vmatpush.msra.mxu0 %v493_v3  ;;  %v489_v8 = vld [vmem:[%s407_s19] sm:$0xff]  ;;  %s484_s26 = scalar_select %p483_p13, %s1678_s16, 1 }
  0x6f   : > { %541 = vmatpush.msra.mxu1 %v521_v4  ;;  %564 = vmatpush.msra.mxu2 %v521_v4  ;;  %v635_v27 = vld [vmem:[#allocation11] sm:$0xff]  ;;  %s1997_s19 = sld [smem:[#allocation27_spill]]  ;;  %s475_s16 = scalar_lea.vmem [#allocation13], %s1823_s18 }
  0x70   : > { %513 = vmatpush.msra.mxu0 %v492_v5  ;;  %s1219_s23 = sshll.u32 %s484_s26, 5  ;;  %s1001_s1 = sshll.u32 %s475_s16, 4  ;;  %s1002_s1 = int_to_ptr.vmem [resolvable:$true] %s1001_s1 }
  0x71   : > { %542 = vmatpush.msra.mxu1 %v520_v6  ;;  %565 = vmatpush.msra.mxu2 %v520_v6  ;;  %s1875_s21 = scalar_lea.vmem %s1958_s9, %s1219_s23  ;;  %s1535_s18 = scalar_lea.hbm %s1957_s8, 16 }
  0x72   : > { %514 = vmatpush.msra.mxu0 %v491_v7  ;;  %1197 = vmatmul.msk.f32.vlgmr.msra.gmra.mxu1 %vm495_vm0, %v489_v8 }
  0x73   : > { %1196 = vmatmul.msk.f32.vlgmr.msra.gmra.mxu0 %vm495_vm0, %v1848_v9  ;;  %1198 = vmatmul.msk.f32.vlgmr.msra.gmra.mxu2 %vm495_vm0, %v490_v10 }
  0x74   : > { %654 = vmatpush.msrb.mxu0 %v635_v27 }
  0xef   : > { %v544_v11 = vpop.f32.mrf.mxu1 }
  0xf0   : > { %v516_v12 = vpop.f32.mrf.mxu0  ;;  %662 = vrot.lane.b32.xlu0 %v544_v11, %s1600_s28  ;;  %1199 = vmatpush.xpose.msk.msra.mxu3 %vm570_vm1, %v544_v11 }
  0xf1   : > { %v519_v13 = vmul.f32 0.35355338, %v516_v12 }
  0xf3   : > { %1200 = vmatmul.msk.f32.vlgmr.msra.gmra.mxu3 %vm570_vm1, %v519_v13 }
  0xf6   : > { %v1856_v14 = vpop.f32.mrf.mxu2 }
  0xf7   : > { %630 = vmatpush.msrb.mxu3 %v1856_v14 }
  0xf8   : > { %660 = vrot.lane.b32.xlu0 %v519_v13, %s1600_s28 }
  0xf9   : > { %749 = vmatpush.msra.mxu3 %v730_v40 }
 0x100   : > { %704 = vrot.lane.b32.xlu0 %v1856_v14, %s1600_s28  ;;  %s1003_s28 = sshll.u32 %s999_s7, 4  ;;  %s1004_s28 = int_to_ptr.hbm [resolvable:$true] %s1003_s28 }
 0x108   : > { %755 = vrot.lane.b32.xlu0 %v519_v13, %s1601_s29 }
 0x110   : > { %849 = vrot.lane.b32.xlu0 %v519_v13, %s1602_s25 }
 0x162   : > { %v663_v15 = vpop.permute.xlu0 %662 }
 0x163   : > { %1203 = vmatpush.xpose.msk.msrb.mxu1 %vm570_vm1, %v663_v15  ;;  %v918_v15 = vld [vmem:[#allocation11 + $0x18] sm:$0xff] }
 0x16a   : > { %v661_v16 = vpop.permute.xlu0 %660 }
 0x16b   : > { %1204 = vmatmul.msk.f32.vlgmr.msrb.gmra.mxu1 %vm570_vm1, %v661_v16 }
 0x172   : > { %v705_v17 = vpop.permute.xlu0 %704 }
 0x173   : > { %725 = vmatpush.msrb.mxu2 %v705_v17 }
 0x176   : > { %v594_v18 = vpop.f32.mrf.mxu3 }
 0x177   : > { %v597_v19 = vsel %vm570_vm1, %v594_v18, -inf }
 0x178   : > { %598 = vmax.xlane.f32.xlu1 %v597_v19 }
 0x17a   : > { %v756_v49 = vpop.permute.xlu0 %755 }
 0x182   : > { %v850_v51 = vpop.permute.xlu0 %849 }
 0x1e8   : > { %v685_v20 = vpop.f32.mrf.mxu1 }
 0x1e9   : > { %v688_v21 = vsel %vm570_vm1, %v685_v20, -inf }
 0x1ea   : > { %689 = vmax.xlane.f32.xlu1 %v688_v21 }
 0x1eb   : > { %v599_v22 = vpop.xlane.xlu1 %598 }
 0x1ec   : > { %v600_v23 = vsub.f32 %v594_v18, %v599_v22 }
 0x1ee   : > { %v601_v24 = vmul.f32 1.442695, %v600_v23 }
 0x1f0   : > { %1315 = vpow2.f32 %v601_v24 }
 0x1f6   : > { %v1316_v25 = vpop.eup %1315 }
 0x1f7   : > { %v603_v26 = vsel %vm570_vm1, %v1316_v25, 0.0 }
 0x1f8   : > { %604 = vadd.xlane.f32.xlu2 %v603_v26 }
 0x203   : > { %757 = vrot.lane.b32.xlu1 %v544_v11, %s1601_s29 }
 0x25d   : > { %v690_v28 = vpop.xlane.xlu1 %689 }
 0x25e   : > { %v691_v29 = vsub.f32 %v685_v20, %v690_v28 }
 0x260   : > { %v692_v30 = vmul.f32 1.442695, %v691_v29  ;;  %v1603_v29 = vmov 32.0  }
 0x262   : > { %1317 = vpow2.f32 %v692_v30 }
 0x268   : > { %v1318_v31 = vpop.eup %1317 }
 0x269   : > { %v694_v32 = vsel %vm570_vm1, %v1318_v31, 0.0 }
 0x26a   : > { %695 = vadd.xlane.f32.xlu2 %v694_v32 }
 0x26b   : > { %v605_v33 = vpop.xlane.xlu2 %604 }
 0x26c   : > { %1319 = vrcp.f32 %v605_v33 }
 0x272   : > { %v1320_v34 = vpop.eup %1319 }
 0x273   : > { %v607_v35 = vmul.f32 %v1320_v34, %v605_v33 }
 0x275   : > { %v608_v36 = vsub.f32 2.0, %v607_v35  ;;  %v758_v37 = vpop.permute.xlu1 %757 }
 0x276   : > { %1207 = vmatpush.xpose.msk.msra.mxu0 %vm570_vm1, %v758_v37 }
 0x277   : > { %v609_v38 = vmul.f32 %v1320_v34, %v608_v36 }
 0x279   : > { %v610_v39 = vmul.f32 %v1316_v25, %v609_v38 }
 0x27b   : > { %611 = vst.msk [vmem:[%s1875_s21] sm:$0xff] %vm570_vm1, %v610_v39  ;;  %1201 = vmatmul.msk.f32.vlgmr.msrb.gmra.mxu3 %vm570_vm1, %v610_v39 }
 0x282   : > { %851 = vrot.lane.b32.xlu2 %v544_v11, %s1602_s25 }
 0x2dd   : > { %v696_v41 = vpop.xlane.xlu2 %695 }
 0x2de   : > { %1321 = vrcp.f32 %v696_v41 }
 0x2e4   : > { %v1322_v42 = vpop.eup %1321 }
 0x2e5   : > { %v698_v43 = vmul.f32 %v1322_v42, %v696_v41  ;;  %v852_v44 = vpop.permute.xlu2 %851 }
 0x2e6   : > { %1211 = vmatpush.xpose.msk.msrb.mxu3 %vm570_vm1, %v852_v44 }
 0x2e7   : > { %v699_v45 = vsub.f32 2.0, %v698_v43 }
 0x2e9   : > { %v700_v46 = vmul.f32 %v1322_v42, %v699_v45 }
 0x2eb   : > { %v701_v47 = vmul.f32 %v1318_v31, %v700_v46 }
 0x2ed   : > { %702 = vst.msk [vmem:[%s1875_s21 + $0x8] sm:$0xff] %vm570_vm1, %v701_v47  ;;  %1205 = vmatmul.msk.f32.vlgmr.msrb.gmra.mxu2 %vm570_vm1, %v701_v47 }
 0x2fe   : > { %v632_v48 = vpop.f32.mrf.mxu3 }
 0x2ff   : > { %1202 = vmatmul.msk.f32.vlgmr.msrb.gmra.mxu0 %vm570_vm1, %v632_v48 }
 0x307   : > { %1208 = vmatmul.msk.f32.vlgmr.msra.gmra.mxu0 %vm570_vm1, %v756_v49 }
 0x370   : > { %v727_v50 = vpop.f32.mrf.mxu2 }
 0x371   : > { %1206 = vmatmul.msk.f32.vlgmr.msra.gmra.mxu3 %vm570_vm1, %v727_v50  ;;  %v1313_v50 = vld [vmem:[%s1955_s6] ss:$0 sm:$0xff] }
 0x379   : > { %1212 = vmatmul.msk.f32.vlgmr.msrb.gmra.mxu3 %vm570_vm1, %v850_v51 }
 0x37c   : > { %v656_v52 = vpop.f32.mrf.mxu0 }
 0x37d   : > { %v659_v55 = vadd.f32 %v656_v52, %v1848_v9 }
 0x384   : > { %v780_v53 = vpop.f32.mrf.mxu0 }
 0x385   : > { %v783_v54 = vsel %vm570_vm1, %v780_v53, -inf }
 0x386   : > { %784 = vmax.xlane.f32.xlu0 %v783_v54 }
 0x39a   : > { %798 = vrot.lane.b32.xlu0 %v1856_v14, %s1601_s29  ;;  %s984_s29 = scalar_lea.sflag [#allocation4], %s1820_s15 }
 0x3f4   : > { %v751_v56 = vpop.f32.mrf.mxu3 }
 0x3f5   : > { %v754_v57 = vadd.f32 %v751_v56, %v659_v55 }
 0x3f9   : > { %v785_v58 = vpop.xlane.xlu0 %784 }
 0x3fa   : > { %v786_v59 = vsub.f32 %v780_v53, %v785_v58  ;;  %v1314_v53 = vld [vmem:[%s1997_s19] ss:$0 sm:$0xff] }
 0x3fc   : > { %v787_v60 = vmul.f32 1.442695, %v786_v59  ;;  %v874_v61 = vpop.f32.mrf.mxu3 }
 0x3fd   : > { %v877_v62 = vsel %vm570_vm1, %v874_v61, -inf }
 0x3fe   : > { %1323 = vpow2.f32 %v787_v60  ;;  %878 = vmax.xlane.f32.xlu2 %v877_v62 }
 0x404   : > { %v1324_v63 = vpop.eup %1323 }
 0x405   : > { %v789_v0 = vsel %vm570_vm1, %v1324_v63, 0.0 }
 0x406   : > { %790 = vadd.xlane.f32.xlu1 %v789_v0 }
 0x40c   : > { %v799_v1 = vpop.permute.xlu0 %798 }
 0x40d   : > { %819 = vmatpush.msra.mxu1 %v799_v1 }
 0x40f   : > { %937 = vmatpush.msrb.mxu1 %v918_v15 }
 0x41f   : > { %892 = vrot.lane.b32.xlu1 %v1856_v14, %s1602_s25  ;;  %v824_v14 = vld [vmem:[#allocation11 + $0x10] sm:$0xff]  ;;  %s1529_s25 = sshra.s32 %s1004_s28, 4  ;;  %s1530_s25 = int_to_ptr.hbm [resolvable:$true] %s1529_s25 }
 0x420   : > { %843 = vmatpush.msra.mxu2 %v824_v14  ;;  %s1531_s26 = scalar_lea.hbm %s1530_s25, 8  ;;  %p1536_p10 = scmp.lt.s32.totalorder %s1530_s25, %s1957_s8 }
 0x421   : > { %p1532_p4 = scmp.ne.s32.totalorder %s1530_s25, %s1531_s26  ;;  %p1537_p6 = scmp.lt.s32.totalorder %s1535_s18, %s1531_s26 }
 0x423   : > { %p1533_p1 = pnand %p1532_p4, %p1723_p0  ;;  %p1538_p11 = por %p1537_p6, %p1536_p10 }
 0x425   : > { %p1534_p7 = pneg %p1533_p1 }
 0x427   : > { %p1539_p12 = pnand %p1538_p11, %p1534_p7 }
 0x471   : > { %v879_v2 = vpop.xlane.xlu2 %878 }
 0x472   : > { %v880_v3 = vsub.f32 %v874_v61, %v879_v2 }
 0x474   : > { %v881_v4 = vmul.f32 1.442695, %v880_v3 }
 0x476   : > { %1325 = vpow2.f32 %v881_v4 }
 0x479   : > { %v791_v5 = vpop.xlane.xlu1 %790 }
 0x47a   : > { %1327 = vrcp.f32 %v791_v5 }
 0x47c   : > { %v1326_v6 = vpop.eup %1325 }
 0x47d   : > { %v883_v7 = vsel %vm570_vm1, %v1326_v6, 0.0 }
 0x47e   : > { %884 = vadd.xlane.f32.xlu2 %v883_v7 }
 0x480   : > { %v1328_v8 = vpop.eup %1327 }
 0x481   : > { %v793_v9 = vmul.f32 %v1328_v8, %v791_v5 }
 0x483   : > { %v794_v10 = vsub.f32 2.0, %v793_v9 }
 0x485   : > { %v795_v11 = vmul.f32 %v1328_v8, %v794_v10 }
 0x487   : > { %v796_v12 = vmul.f32 %v1324_v63, %v795_v11 }
 0x489   : > { %797 = vst.msk [vmem:[%s1875_s21 + $0x10] sm:$0xff] %vm570_vm1, %v796_v12  ;;  %1209 = vmatmul.msk.f32.vlgmr.msra.gmra.mxu1 %vm570_vm1, %v796_v12 }
 0x491   : > { %v893_v13 = vpop.permute.xlu1 %892 }
 0x492   : > { %913 = vmatpush.msrb.mxu0 %v893_v13 }
 0x4f1   : > { %v885_v16 = vpop.xlane.xlu2 %884 }
 0x4f2   : > { %1329 = vrcp.f32 %v885_v16 }
 0x4f3   : > { %1331 = vrcp.f32 %v1603_v29 }
 0x4f8   : > { %v1330_v17 = vpop.eup %1329 }
 0x4f9   : > { %v887_v18 = vmul.f32 %v1330_v17, %v885_v16  ;;  %v1332_v30 = vpop.eup %1331 }
 0x4fa   : > { %v947_v31 = vmul.f32 32.0, %v1332_v30  ;;  %vm951_vm2 = vweird.f32 %v1332_v30 }
 0x4fb   : > { %v888_v19 = vsub.f32 2.0, %v887_v18 }
 0x4fc   : > { %v948_v32 = vsub.f32 1.0, %v947_v31 }
 0x4fd   : > { %v889_v20 = vmul.f32 %v1330_v17, %v888_v19 }
 0x4fe   : > { %v949_v33 = vmul.f32 %v1332_v30, %v948_v32 }
 0x4ff   : > { %v890_v21 = vmul.f32 %v1326_v6, %v889_v20 }
 0x500   : > { %v950_v34 = vadd.f32 %v1332_v30, %v949_v33 }
 0x501   : > { %891 = vst.msk [vmem:[%s1875_s21 + $0x18] sm:$0xff] %vm570_vm1, %v890_v21  ;;  %1213 = vmatmul.msk.f32.vlgmr.msrb.gmra.mxu0 %vm570_vm1, %v890_v21 }
 0x502   : > { %v952_v35 = vsel %vm951_vm2, %v1332_v30, %v950_v34 }
 0x506   : > { %v821_v22 = vpop.f32.mrf.mxu1 }
 0x507   : > { %1210 = vmatmul.msk.f32.vlgmr.msra.gmra.mxu2 %vm570_vm1, %v821_v22 }
 0x57e   : > { %v915_v23 = vpop.f32.mrf.mxu0 }
 0x57f   : > { %1214 = vmatmul.msk.f32.vlgmr.msrb.gmra.mxu1 %vm570_vm1, %v915_v23 }
 0x58a   : > { %v845_v24 = vpop.f32.mrf.mxu2 }
 0x58b   : > { %v848_v25 = vadd.f32 %v845_v24, %v754_v57 }
 0x5fc   : > { %v939_v26 = vpop.f32.mrf.mxu1 }
 0x5fd   : > { %v942_v27 = vadd.f32 %v939_v26, %v848_v25 }
 0x5ff   : > { %v943_v28 = vsel %vm495_vm0, %v942_v27, 0.0 }
 0x600   : > { %944 = vadd.xlane.f32.xlu2 %v943_v28 }
 0x673   : > { %v945_v36 = vpop.xlane.xlu2 %944 }
 0x674   : > { %v953_v37 = vmul.f32 %v952_v35, %v945_v36 }
 0x676   : > { %v954_v38 = vsub.f32 %v942_v27, %v953_v37 }
 0x678   : > { %v955_v39 = vmul.f32 %v954_v38, %v954_v38 }
 0x67a   : > { %v956_v40 = vsel %vm495_vm0, %v955_v39, 0.0 }
 0x67b   : > { %957 = vadd.xlane.f32.xlu2 %v956_v40 }
 0x6ee   : > { %v958_v41 = vpop.xlane.xlu2 %957 }
 0x6ef   : > { %v959_v42 = vmul.f32 %v958_v41, %v952_v35 }
 0x6f1   : > { %v960_v43 = vadd.f32 1e-06, %v959_v42 }
 0x6f3   : > { %1333 = vrsqrt.f32 %v960_v43  ;;  %vm967_vm4 = vweird.f32 %v960_v43 }
 0x6f9   : > { %v1334_v44 = vpop.eup %1333 }
 0x6fa   : > { %v962_v45 = vmul.f32 %v1334_v44, %v960_v43  ;;  %vm968_vm3 = vweird.f32 %v1334_v44 }
 0x6fb   : > { %vm969_vm5 = vmor %vm967_vm4, %vm968_vm3 }
 0x6fc   : > { %v963_v46 = vmul.f32 %v1334_v44, %v962_v45 }
 0x6fe   : > { %v964_v47 = vmul.f32 0.5, %v963_v46 }
 0x700   : > { %v965_v48 = vsub.f32 1.5, %v964_v47 }
 0x702   : > { %v966_v49 = vmul.f32 %v1334_v44, %v965_v48 }
 0x704   : > { %v970_v51 = vsel %vm969_vm5, %v1334_v44, %v966_v49 }
 0x705   : > { %v971_v52 = vmul.f32 %v970_v51, %v954_v38 }
 0x707   : > { %v976_v54 = vmul.f32 %v1313_v50, %v971_v52 }
 0x709   : > { %v981_v55 = vadd.f32 %v1314_v53, %v976_v54 }
 0x70b   : > { %982 = vst.msk [vmem:[%s475_s16] sm:$0xff] %vm495_vm0, %v981_v55 }
 0x70c   : > { %1542 = shalt.err (!%p1539_p12)
}
 0x70d   : > { %1238 = dma.vmem_to_hbm [thread:$0]  (%p1723_p0), %s1002_s1, 128, %s1004_s28, %s984_s29  }
 0x70e PF: > { %s1998_s15 = sld [smem:[#allocation19_spill]] }
 0x70f   : > { %s2000_s27 = sld [smem:[#allocation20_spill]] }
 0x714   : > { %s1018_s24 = sand.u32 1, %s1998_s15  }
 0x715   : > { %p2001_p3 = scmp.ge.s32.totalorder %s2000_s27, 2  ;;  %s1019_s22 = scalar_lea.sflag [#allocation4], %s1018_s24 }
 0x717   : > { %p1261_p8 = pnand %p2001_p3, %p1729_p5 }
 0x719   : > { %p1262_p9 = pneg %p1261_p8 }
 0x71b   : > { %1576 = dma.done.wait (%p1262_p9), %s1019_s22, 128  }
 0x71c   : > { %1578 = vsyncadd (%p1262_p9), %s1019_s22, 4294967168  ;;  %s2002_s12 = sld [smem:[#allocation21_spill]]  ;;  %s2004_s30 = smov %s1585_s10 }
 0x71d   : > { %s2003_s14 = sld [smem:[#allocation22_spill]]  ;;  %s2005_s10 = smov %s1589_s11 }
 0x722   : > { %p28_p2 = scmp.ge.s32.totalorder %s2002_s12, 4  }
 0x723   : > { %s2006_s11 = smov %s2003_s14 }
 0x724   :  { %30 = sbr.rel (!%p28_p2) target bundleno = 13 (0xd), region = 145 }
 0x729   :  { %1033 = vsyncpa [#allocation3], 1 }
 0x72a   :  { %1035 = vsyncpa [#allocation3 + $0x1], 1 }
 0x72b   :  { %1036 = vsyncpa [#allocation6], 1 }
 0x72c   :  { %1038 = vsyncpa [#allocation6 + $0x1], 1 }
 0x72d   :  { %1039 = vsyncpa [#allocation9], 1 }
 0x72e   :  { %1040 = vsyncpa [#allocation12], 1 }
 0x72f   :  { %1041 = vsyncpa [#allocation4], 1 }
 0x730   :  { %1043 = vsyncpa [#allocation4 + $0x1], 1 }

</bundles_post_ra>
